<compile_context>
chip_gen: v7x
topology: tpu7x:2x2x1
jax: 0.10.0
libtpu: 0.0.40
codegen_flags: <defaults>
</compile_context>

<pallas_src>
import functools

import numpy as np
import jax
import jax.numpy as jnp
from jax import lax
from jax.experimental import pallas as pl
from jax.experimental.pallas import tpu as pltpu


KSIZE = 11          # conv kernel size used by both proj and PA
PAD = KSIZE // 2    # = 5
HALO = 8            # sublane-aligned halo (>= PAD) for the depthwise scratch
LN_EPS = 1e-6


# ----------------------------------------------------------------------------
# Fused kernel: proj matmul (bias folded in)  ->  PA depthwise conv + sigmoid
#               gate  ->  LayerNorm over channels
# ----------------------------------------------------------------------------
def _patch_embed_kernel(patches_ref, wp_ref, dw_ref, db_ref, gamma_ref,
                        beta_ref, out_ref, ypad_ref, *, with_pos):
    # ---- projection conv as im2col matmul (bias folded via ones column) ---
    # patches_ref: (1, L_out, CKp)   wp_ref: (CKp, OC)
    y = jnp.dot(patches_ref[0], wp_ref[...],
                preferred_element_type=jnp.float32)
    l_out, oc = y.shape

    if with_pos:
        # ---- PA: depthwise conv (k=11, pad=5, groups=OC) + sigmoid gate ----
        # Aligned-halo padded scratch: rows [0,HALO) and [HALO+l_out, +HALO)
        # are zero; y sits at the sublane-aligned offset HALO.
        zeros_halo = jnp.zeros((HALO, oc), jnp.float32)
        ypad_ref[pl.ds(0, HALO), :] = zeros_halo
        ypad_ref[pl.ds(HALO + l_out, HALO), :] = zeros_halo
        ypad_ref[pl.ds(HALO, l_out), :] = y

        dw = dw_ref[...]                                  # (K, OC), loaded once
        z = db_ref[...]                                   # (1, OC), broadcasts
        for k in range(KSIZE):                            # static unroll (11)
            z = z + ypad_ref[pl.ds(HALO - PAD + k, l_out), :] * dw[k:k + 1, :]
        gate = 1.0 / (1.0 + jnp.exp(-z))                  # sigmoid (EUP)
        h = y * gate
    else:
        h = y

    # ---- LayerNorm over channels (eps = 1e-6) -----------------------------
    mean = jnp.mean(h, axis=-1, keepdims=True)
    c = h - mean
    var = jnp.mean(c * c, axis=-1, keepdims=True)
    scale = lax.rsqrt(var + LN_EPS) * gamma_ref[...]
    out_ref[0] = (c * scale + beta_ref[...]).astype(out_ref.dtype)


# ----------------------------------------------------------------------------
# Wrapper module
# ----------------------------------------------------------------------------
class PatchEmbedPallas:
    def __init__(self, in_ch=3, out_ch=96, patch_size=2, with_pos=True,
                 key=jax.random.PRNGKey(0)):
        self.in_ch = in_ch
        self.out_ch = out_ch
        self.patch_size = patch_size
        self.with_pos = with_pos

        k1, k2, k3, k4 = jax.random.split(key, 4)
        # PyTorch-style uniform init bounds
        bnd_p = 1.0 / np.sqrt(in_ch * KSIZE)
        self.w_proj = jax.random.uniform(k1, (out_ch, in_ch, KSIZE),
                                         jnp.float32, -bnd_p, bnd_p)
        self.b_proj = jax.random.uniform(k2, (out_ch,), jnp.float32,
                                         -bnd_p, bnd_p)
        bnd_a = 1.0 / np.sqrt(1 * KSIZE)
        self.w_pa = jax.random.uniform(k3, (out_ch, 1, KSIZE),
                                       jnp.float32, -bnd_a, bnd_a)
        self.b_pa = jax.random.uniform(k4, (out_ch,), jnp.float32,
                                       -bnd_a, bnd_a)
        self.gamma = jnp.ones((out_ch,), jnp.float32)
        self.beta = jnp.zeros((out_ch,), jnp.float32)

        # Pre-packed kernel operands (lane axis = out_ch everywhere).
        ck = in_ch * KSIZE
        self.ck = ck
        # Pad contraction dim to x8 with room for one bias column.
        self.ckp = ((ck + 1 + 7) // 8) * 8
        wp = jnp.transpose(self.w_proj, (1, 2, 0)).reshape(ck, out_ch)
        wp_full = jnp.zeros((self.ckp, out_ch), jnp.float32)
        wp_full = wp_full.at[:ck].set(wp)
        wp_full = wp_full.at[ck].set(self.b_proj)         # folded bias row
        self.wp = wp_full                                 # (CKp, OC)
        self.dw = jnp.transpose(self.w_pa[:, 0, :], (1, 0))   # (K, OC)
        self.db2 = self.b_pa[None, :]                          # (1, OC)
        self.g2 = self.gamma[None, :]                           # (1, OC)
        self.be2 = self.beta[None, :]                            # (1, OC)

    # im2col of the zero-padded input: (B, L_out, CKp); last column is the
    # ones column that picks up the folded projection bias.
    def _im2col(self, x):
        B, C, L = x.shape
        s = self.patch_size
        l_out = (L + 2 * PAD - KSIZE) // s + 1
        xp = jnp.pad(x, ((0, 0), (0, 0), (PAD, PAD)))
        cols = [xp[:, :, k:k + s * (l_out - 1) + 1:s] for k in range(KSIZE)]
        patches = jnp.stack(cols, axis=-1)               # (B, C, L_out, K)
        patches = patches.transpose(0, 2, 1, 3).reshape(B, l_out, C * KSIZE)
        patches = jnp.pad(patches, ((0, 0), (0, 0), (0, self.ckp - self.ck)))
        patches = patches.at[:, :, self.ck].set(1.0)     # bias column
        return patches, l_out

    def __call__(self, x):
        x = jnp.asarray(x, jnp.float32)
        B, C, L = x.shape
        assert C == self.in_ch
        patches, l_out = self._im2col(x)
        oc = self.out_ch
        ckp = self.ckp

        kernel = functools.partial(_patch_embed_kernel, with_pos=self.with_pos)
        flops = B * (2 * l_out * ckp * oc + l_out * oc * (2 * KSIZE + 12))
        bytes_acc = 4 * (patches.size + self.wp.size + B * l_out * oc
                         + (KSIZE + 3) * oc)

        out = pl.pallas_call(
            kernel,
            out_shape=jax.ShapeDtypeStruct((B, l_out, oc), jnp.float32),
            grid_spec=pltpu.PrefetchScalarGridSpec(
                num_scalar_prefetch=0,
                grid=(B,),
                in_specs=[
                    pl.BlockSpec((1, l_out, ckp), lambda b: (b, 0, 0)),  # patches
                    pl.BlockSpec((ckp, oc), lambda b: (0, 0)),           # proj W (+bias row)
                    pl.BlockSpec((KSIZE, oc), lambda b: (0, 0)),         # PA dw W
                    pl.BlockSpec((1, oc), lambda b: (0, 0)),             # PA bias
                    pl.BlockSpec((1, oc), lambda b: (0, 0)),             # LN gamma
                    pl.BlockSpec((1, oc), lambda b: (0, 0)),             # LN beta
                ],
                out_specs=pl.BlockSpec((1, l_out, oc), lambda b: (b, 0, 0)),
                scratch_shapes=[
                    pltpu.VMEM((l_out + 2 * HALO, oc), jnp.float32)],
            ),
            compiler_params=pltpu.CompilerParams(
                dimension_semantics=("parallel",)),
            cost_estimate=pl.CostEstimate(
                flops=int(flops),
                transcendentals=int(B * l_out * oc),
                bytes_accessed=int(bytes_acc)),
        )(patches, self.wp, self.dw, self.db2, self.g2, self.be2)

        return out, L // self.patch_size


# ----------------------------------------------------------------------------
# Pure-JAX reference (mirrors the PyTorch module)
# ----------------------------------------------------------------------------
def ref_forward(x, m):
    y = lax.conv_general_dilated(
        x, m.w_proj, window_strides=(m.patch_size,), padding=((PAD, PAD),),
        dimension_numbers=("NCH", "OIH", "NCH"),
        precision=lax.Precision.HIGHEST)
    y = y + m.b_proj[None, :, None]
    if m.with_pos:
        z = lax.conv_general_dilated(
            y, m.w_pa, window_strides=(1,), padding=((PAD, PAD),),
            dimension_numbers=("NCH", "OIH", "NCH"),
            feature_group_count=m.out_ch,
            precision=lax.Precision.HIGHEST)
        z = z + m.b_pa[None, :, None]
        y = y * jax.nn.sigmoid(z)
    h = jnp.transpose(y, (0, 2, 1))                  # (B, L_out, OC)
    mean = jnp.mean(h, -1, keepdims=True)
    var = jnp.mean((h - mean) ** 2, -1, keepdims=True)
    return (h - mean) * lax.rsqrt(var + LN_EPS) * m.gamma + m.beta


# ----------------------------------------------------------------------------
if __name__ == "__main__":
    B, C, L = 2, 3, 16                               # small, matches the module
    key = jax.random.PRNGKey(0)
    kx, kp = jax.random.split(key)
    x = jax.random.normal(kx, (B, C, L), dtype=jnp.float32)

    model = PatchEmbedPallas(in_ch=C, out_ch=96, patch_size=2,
                             with_pos=True, key=kp)
    out, l_new = model(x)
    out = jax.block_until_ready(out)

    ref = ref_forward(x, model)
    assert out.shape == (B, L // 2, 96) and l_new == L // 2
    np.testing.assert_allclose(np.asarray(out), np.asarray(ref),
                               rtol=1e-4, atol=1e-4)

    print("KERNEL_OK")
</pallas_src>

<mosaic_0001>
module attributes {stable_mosaic.version = 11 : i64} {
  func.func @_patch_embed_kernel(%arg0: i32, %arg1: memref<1x8x40xf32, #tpu.memory_space<vmem>>, %arg2: memref<40x96xf32, #tpu.memory_space<vmem>>, %arg3: memref<11x96xf32, #tpu.memory_space<vmem>>, %arg4: memref<1x96xf32, #tpu.memory_space<vmem>>, %arg5: memref<1x96xf32, #tpu.memory_space<vmem>>, %arg6: memref<1x96xf32, #tpu.memory_space<vmem>>, %arg7: memref<1x8x96xf32, #tpu.memory_space<vmem>>, %arg8: memref<24x96xf32, #tpu.memory_space<vmem>>) attributes {dimension_semantics = [#tpu.dimension_semantics<parallel>], iteration_bounds = array<i64: 2>, scalar_prefetch = 0 : i64, scratch_operands = 1 : i64, tpu.core_type = #tpu.core_type<tc>, window_params = [{transform_indices = @transform_0, window_bounds = array<i64: 1, 8, 40>}, {pipeline_mode = #tpu.pipeline_mode<synchronous>, transform_indices = @transform_1, window_bounds = array<i64: 40, 96>}, {pipeline_mode = #tpu.pipeline_mode<synchronous>, transform_indices = @transform_2, window_bounds = array<i64: 11, 96>}, {pipeline_mode = #tpu.pipeline_mode<synchronous>, transform_indices = @transform_3, window_bounds = array<i64: 1, 96>}, {pipeline_mode = #tpu.pipeline_mode<synchronous>, transform_indices = @transform_4, window_bounds = array<i64: 1, 96>}, {pipeline_mode = #tpu.pipeline_mode<synchronous>, transform_indices = @transform_5, window_bounds = array<i64: 1, 96>}, {transform_indices = @transform_6, window_bounds = array<i64: 1, 8, 96>}]} {
    %c0 = arith.constant 0 : index
    %c0_0 = arith.constant 0 : index
    %c0_1 = arith.constant 0 : index
    %0 = vector.load %arg1[%c0, %c0_0, %c0_1] : memref<1x8x40xf32, #tpu.memory_space<vmem>>, vector<1x8x40xf32>
    %1 = vector.shape_cast %0 : vector<1x8x40xf32> to vector<8x40xf32>
    %c0_2 = arith.constant 0 : index
    %c0_3 = arith.constant 0 : index
    %2 = vector.load %arg2[%c0_2, %c0_3] : memref<40x96xf32, #tpu.memory_space<vmem>>, vector<40x96xf32>
    %cst = arith.constant dense<0.000000e+00> : vector<8x96xf32>
    %3 = tpu.matmul %1, %2, %cst {dimension_numbers = #tpu.dot_dimension_numbers<[1], [0], [0], [1], [0, 0, 1, 1], [], []>} : vector<8x40xf32>, vector<40x96xf32>, vector<8x96xf32> -> vector<8x96xf32>
    %cst_4 = arith.constant 0.000000e+00 : f32
    %4 = vector.broadcast %cst_4 : f32 to vector<8x96xf32>
    %c0_5 = arith.constant 0 : index
    %c0_6 = arith.constant 0 : index
    %5 = vector.load %arg8[%c0_5, %c0_6] : memref<24x96xf32, #tpu.memory_space<vmem>>, vector<8x96xf32>
    tpu.vector_store %arg8[%c0_5, %c0_6], %4 {strides = array<i32>} : memref<24x96xf32, #tpu.memory_space<vmem>>, vector<8x96xf32>,
    %c16 = arith.constant 16 : index
    %c0_7 = arith.constant 0 : index
    %6 = vector.load %arg8[%c16, %c0_7] : memref<24x96xf32, #tpu.memory_space<vmem>>, vector<8x96xf32>
    tpu.vector_store %arg8[%c16, %c0_7], %4 {strides = array<i32>} : memref<24x96xf32, #tpu.memory_space<vmem>>, vector<8x96xf32>,
    %c8 = arith.constant 8 : index
    %c0_8 = arith.constant 0 : index
    %7 = vector.load %arg8[%c8, %c0_8] : memref<24x96xf32, #tpu.memory_space<vmem>>, vector<8x96xf32>
    tpu.vector_store %arg8[%c8, %c0_8], %3 {strides = array<i32>} : memref<24x96xf32, #tpu.memory_space<vmem>>, vector<8x96xf32>,
    %c0_9 = arith.constant 0 : index
    %c0_10 = arith.constant 0 : index
    %8 = vector.load %arg3[%c0_9, %c0_10] : memref<11x96xf32, #tpu.memory_space<vmem>>, vector<11x96xf32>
    %c0_11 = arith.constant 0 : index
    %c0_12 = arith.constant 0 : index
    %9 = vector.load %arg4[%c0_11, %c0_12] : memref<1x96xf32, #tpu.memory_space<vmem>>, vector<1x96xf32>
    %c3 = arith.constant 3 : index
    %c0_13 = arith.constant 0 : index
    %10 = vector.load %arg8[%c3, %c0_13] : memref<24x96xf32, #tpu.memory_space<vmem>>, vector<8x96xf32>
    %11 = vector.extract_strided_slice %8 {offsets = [0, 0], sizes = [1, 96], strides = [1, 1]} : vector<11x96xf32> to vector<1x96xf32>
    %12 = vector.broadcast %11 : vector<1x96xf32> to vector<8x96xf32>
    %13 = arith.mulf %10, %12 : vector<8x96xf32>
    %14 = vector.broadcast %9 : vector<1x96xf32> to vector<8x96xf32>
    %15 = arith.addf %14, %13 : vector<8x96xf32>
    %c4 = arith.constant 4 : index
    %c0_14 = arith.constant 0 : index
    %16 = vector.load %arg8[%c4, %c0_14] : memref<24x96xf32, #tpu.memory_space<vmem>>, vector<8x96xf32>
    %17 = vector.extract_strided_slice %8 {offsets = [1, 0], sizes = [1, 96], strides = [1, 1]} : vector<11x96xf32> to vector<1x96xf32>
    %18 = vector.broadcast %17 : vector<1x96xf32> to vector<8x96xf32>
    %19 = arith.mulf %16, %18 : vector<8x96xf32>
    %20 = arith.addf %15, %19 : vector<8x96xf32>
    %c5 = arith.constant 5 : index
    %c0_15 = arith.constant 0 : index
    %21 = vector.load %arg8[%c5, %c0_15] : memref<24x96xf32, #tpu.memory_space<vmem>>, vector<8x96xf32>
    %22 = vector.extract_strided_slice %8 {offsets = [2, 0], sizes = [1, 96], strides = [1, 1]} : vector<11x96xf32> to vector<1x96xf32>
    %23 = vector.broadcast %22 : vector<1x96xf32> to vector<8x96xf32>
    %24 = arith.mulf %21, %23 : vector<8x96xf32>
    %25 = arith.addf %20, %24 : vector<8x96xf32>
    %c6 = arith.constant 6 : index
    %c0_16 = arith.constant 0 : index
    %26 = vector.load %arg8[%c6, %c0_16] : memref<24x96xf32, #tpu.memory_space<vmem>>, vector<8x96xf32>
    %27 = vector.extract_strided_slice %8 {offsets = [3, 0], sizes = [1, 96], strides = [1, 1]} : vector<11x96xf32> to vector<1x96xf32>
    %28 = vector.broadcast %27 : vector<1x96xf32> to vector<8x96xf32>
    %29 = arith.mulf %26, %28 : vector<8x96xf32>
    %30 = arith.addf %25, %29 : vector<8x96xf32>
    %c7 = arith.constant 7 : index
    %c0_17 = arith.constant 0 : index
    %31 = vector.load %arg8[%c7, %c0_17] : memref<24x96xf32, #tpu.memory_space<vmem>>, vector<8x96xf32>
    %32 = vector.extract_strided_slice %8 {offsets = [4, 0], sizes = [1, 96], strides = [1, 1]} : vector<11x96xf32> to vector<1x96xf32>
    %33 = vector.broadcast %32 : vector<1x96xf32> to vector<8x96xf32>
    %34 = arith.mulf %31, %33 : vector<8x96xf32>
    %35 = arith.addf %30, %34 : vector<8x96xf32>
    %c8_18 = arith.constant 8 : index
    %c0_19 = arith.constant 0 : index
    %36 = vector.load %arg8[%c8_18, %c0_19] : memref<24x96xf32, #tpu.memory_space<vmem>>, vector<8x96xf32>
    %37 = vector.extract_strided_slice %8 {offsets = [5, 0], sizes = [1, 96], strides = [1, 1]} : vector<11x96xf32> to vector<1x96xf32>
    %38 = vector.broadcast %37 : vector<1x96xf32> to vector<8x96xf32>
    %39 = arith.mulf %36, %38 : vector<8x96xf32>
    %40 = arith.addf %35, %39 : vector<8x96xf32>
    %c9 = arith.constant 9 : index
    %c0_20 = arith.constant 0 : index
    %41 = vector.load %arg8[%c9, %c0_20] : memref<24x96xf32, #tpu.memory_space<vmem>>, vector<8x96xf32>
    %42 = vector.extract_strided_slice %8 {offsets = [6, 0], sizes = [1, 96], strides = [1, 1]} : vector<11x96xf32> to vector<1x96xf32>
    %43 = vector.broadcast %42 : vector<1x96xf32> to vector<8x96xf32>
    %44 = arith.mulf %41, %43 : vector<8x96xf32>
    %45 = arith.addf %40, %44 : vector<8x96xf32>
    %c10 = arith.constant 10 : index
    %c0_21 = arith.constant 0 : index
    %46 = vector.load %arg8[%c10, %c0_21] : memref<24x96xf32, #tpu.memory_space<vmem>>, vector<8x96xf32>
    %47 = vector.extract_strided_slice %8 {offsets = [7, 0], sizes = [1, 96], strides = [1, 1]} : vector<11x96xf32> to vector<1x96xf32>
    %48 = vector.broadcast %47 : vector<1x96xf32> to vector<8x96xf32>
    %49 = arith.mulf %46, %48 : vector<8x96xf32>
    %50 = arith.addf %45, %49 : vector<8x96xf32>
    %c11 = arith.constant 11 : index
    %c0_22 = arith.constant 0 : index
    %51 = vector.load %arg8[%c11, %c0_22] : memref<24x96xf32, #tpu.memory_space<vmem>>, vector<8x96xf32>
    %52 = vector.extract_strided_slice %8 {offsets = [8, 0], sizes = [1, 96], strides = [1, 1]} : vector<11x96xf32> to vector<1x96xf32>
    %53 = vector.broadcast %52 : vector<1x96xf32> to vector<8x96xf32>
    %54 = arith.mulf %51, %53 : vector<8x96xf32>
    %55 = arith.addf %50, %54 : vector<8x96xf32>
    %c12 = arith.constant 12 : index
    %c0_23 = arith.constant 0 : index
    %56 = vector.load %arg8[%c12, %c0_23] : memref<24x96xf32, #tpu.memory_space<vmem>>, vector<8x96xf32>
    %57 = vector.extract_strided_slice %8 {offsets = [9, 0], sizes = [1, 96], strides = [1, 1]} : vector<11x96xf32> to vector<1x96xf32>
    %58 = vector.broadcast %57 : vector<1x96xf32> to vector<8x96xf32>
    %59 = arith.mulf %56, %58 : vector<8x96xf32>
    %60 = arith.addf %55, %59 : vector<8x96xf32>
    %c13 = arith.constant 13 : index
    %c0_24 = arith.constant 0 : index
    %61 = vector.load %arg8[%c13, %c0_24] : memref<24x96xf32, #tpu.memory_space<vmem>>, vector<8x96xf32>
    %62 = vector.extract_strided_slice %8 {offsets = [10, 0], sizes = [1, 96], strides = [1, 1]} : vector<11x96xf32> to vector<1x96xf32>
    %63 = vector.broadcast %62 : vector<1x96xf32> to vector<8x96xf32>
    %64 = arith.mulf %61, %63 : vector<8x96xf32>
    %65 = arith.addf %60, %64 : vector<8x96xf32>
    %cst_25 = arith.constant 0.000000e+00 : f32
    %66 = vector.broadcast %cst_25 : f32 to vector<8x96xf32>
    %67 = arith.subf %66, %65 : vector<8x96xf32>
    %68 = math.exp %67 : vector<8x96xf32>
    %cst_26 = arith.constant 1.000000e+00 : f32
    %69 = vector.broadcast %cst_26 : f32 to vector<8x96xf32>
    %70 = arith.addf %69, %68 : vector<8x96xf32>
    %cst_27 = arith.constant 1.000000e+00 : f32
    %71 = vector.broadcast %cst_27 : f32 to vector<8x96xf32>
    %72 = arith.divf %71, %70 : vector<8x96xf32>
    %73 = arith.mulf %3, %72 : vector<8x96xf32>
    %cst_28 = arith.constant dense<0.000000e+00> : vector<8xf32>
    %74 = vector.multi_reduction <add>, %73, %cst_28 [1] : vector<8x96xf32> to vector<8xf32>
    %75 = vector.shape_cast %74 : vector<8xf32> to vector<8x1xf32>
    %cst_29 = arith.constant 9.600000e+01 : f32
    %76 = vector.broadcast %cst_29 : f32 to vector<8x1xf32>
    %77 = arith.divf %75, %76 : vector<8x1xf32>
    %78 = vector.broadcast %77 : vector<8x1xf32> to vector<8x96xf32>
    %79 = arith.subf %73, %78 : vector<8x96xf32>
    %80 = arith.mulf %79, %79 : vector<8x96xf32>
    %cst_30 = arith.constant dense<0.000000e+00> : vector<8xf32>
    %81 = vector.multi_reduction <add>, %80, %cst_30 [1] : vector<8x96xf32> to vector<8xf32>
    %82 = vector.shape_cast %81 : vector<8xf32> to vector<8x1xf32>
    %cst_31 = arith.constant 9.600000e+01 : f32
    %83 = vector.broadcast %cst_31 : f32 to vector<8x1xf32>
    %84 = arith.divf %82, %83 : vector<8x1xf32>
    %cst_32 = arith.constant 9.99999997E-7 : f32
    %85 = vector.broadcast %cst_32 : f32 to vector<8x1xf32>
    %86 = arith.addf %84, %85 : vector<8x1xf32>
    %87 = math.rsqrt %86 : vector<8x1xf32>
    %c0_33 = arith.constant 0 : index
    %c0_34 = arith.constant 0 : index
    %88 = vector.load %arg5[%c0_33, %c0_34] : memref<1x96xf32, #tpu.memory_space<vmem>>, vector<1x96xf32>
    %89 = vector.broadcast %87 : vector<8x1xf32> to vector<8x96xf32>
    %90 = vector.broadcast %88 : vector<1x96xf32> to vector<8x96xf32>
    %91 = arith.mulf %89, %90 : vector<8x96xf32>
    %92 = arith.mulf %79, %91 : vector<8x96xf32>
    %c0_35 = arith.constant 0 : index
    %c0_36 = arith.constant 0 : index
    %93 = vector.load %arg6[%c0_35, %c0_36] : memref<1x96xf32, #tpu.memory_space<vmem>>, vector<1x96xf32>
    %94 = vector.broadcast %93 : vector<1x96xf32> to vector<8x96xf32>
    %95 = arith.addf %92, %94 : vector<8x96xf32>
    %c0_37 = arith.constant 0 : index
    %c0_38 = arith.constant 0 : index
    %c0_39 = arith.constant 0 : index
    %96 = vector.load %arg7[%c0_37, %c0_38, %c0_39] : memref<1x8x96xf32, #tpu.memory_space<vmem>>, vector<1x8x96xf32>
    %97 = vector.shape_cast %96 : vector<1x8x96xf32> to vector<8x96xf32>
    %98 = vector.shape_cast %95 : vector<8x96xf32> to vector<1x8x96xf32>
    tpu.vector_store %arg7[%c0_37, %c0_38, %c0_39], %98 {strides = array<i32>} : memref<1x8x96xf32, #tpu.memory_space<vmem>>, vector<1x8x96xf32>,
    return
  }
  func.func @transform_0(%arg0: i32) -> (i32, i32, i32) {
    %c0_i32 = arith.constant 0 : i32
    %c0_i32_0 = arith.constant 0 : i32
    %c0_i32_1 = arith.constant 0 : i32
    return %arg0, %c0_i32, %c0_i32_0 : i32, i32, i32
  }
  func.func @transform_1(%arg0: i32) -> (i32, i32) {
    %c0_i32 = arith.constant 0 : i32
    %c0_i32_0 = arith.constant 0 : i32
    %c0_i32_1 = arith.constant 0 : i32
    return %c0_i32, %c0_i32_0 : i32, i32
  }
  func.func @transform_2(%arg0: i32) -> (i32, i32) {
    %c0_i32 = arith.constant 0 : i32
    %c0_i32_0 = arith.constant 0 : i32
    %c0_i32_1 = arith.constant 0 : i32
    return %c0_i32, %c0_i32_0 : i32, i32
  }
  func.func @transform_3(%arg0: i32) -> (i32, i32) {
    %c0_i32 = arith.constant 0 : i32
    %c0_i32_0 = arith.constant 0 : i32
    %c0_i32_1 = arith.constant 0 : i32
    return %c0_i32, %c0_i32_0 : i32, i32
  }
  func.func @transform_4(%arg0: i32) -> (i32, i32) {
    %c0_i32 = arith.constant 0 : i32
    %c0_i32_0 = arith.constant 0 : i32
    %c0_i32_1 = arith.constant 0 : i32
    return %c0_i32, %c0_i32_0 : i32, i32
  }
  func.func @transform_5(%arg0: i32) -> (i32, i32) {
    %c0_i32 = arith.constant 0 : i32
    %c0_i32_0 = arith.constant 0 : i32
    %c0_i32_1 = arith.constant 0 : i32
    return %c0_i32, %c0_i32_0 : i32, i32
  }
  func.func @transform_6(%arg0: i32) -> (i32, i32, i32) {
    %c0_i32 = arith.constant 0 : i32
    %c0_i32_0 = arith.constant 0 : i32
    %c0_i32_1 = arith.constant 0 : i32
    return %arg0, %c0_i32, %c0_i32_0 : i32, i32, i32
  }
}

</mosaic_0001>

<bundles_post_ra>
// kernel: tpu_custom_call.1
= control target key start
LH: loop header
LB: loop body
LE: loop exit
PB: predicated region body
PF: predicated region fallthrough
CT: control target
= control target key end

     0   :  { %11 = vsyncpa [#allocation4], 0  ;;  %s1184_s0 = inlined_call_operand.hbm [shape: f32[2,8,40], index: 0, kind: input, shape index: {}]   ;;  %s1185_s1 = inlined_call_operand.hbm [shape: f32[40,96], index: 1, kind: input, shape index: {}]   ;;  %s1186_s2 = inlined_call_operand.hbm [shape: f32[11,96], index: 2, kind: input, shape index: {}]   ;;  %s1187_s3 = inlined_call_operand.vmem [shape: f32[1,96], index: 3, kind: input, shape index: {}]   ;;  %s1188_s4 = inlined_call_operand.vmem [shape: f32[1,96], index: 4, kind: input, shape index: {}]   ;;  %s1189_s5 = inlined_call_operand.vmem [shape: f32[1,96], index: 5, kind: input, shape index: {}]   ;;  %s1190_s6 = inlined_call_operand.hbm [shape: f32[2,8,96], index: 6, kind: output, shape index: {}]  }
   0x1   :  { %13 = vsyncpa [#allocation4 + $0x1], 0 }
   0x2   :  { %14 = vsyncpa [#allocation7], 0 }
   0x3   :  { %15 = vsyncpa [#allocation5], 0 }
   0x4   :  { %17 = vsyncpa [#allocation5 + $0x1], 0  ;;  %s932_s21 = smov 0   ;;  %s934_s22 = smov 0  }
   0x5   :  { %s936_s23 = smov 0   ;;  %s938_s24 = smov 0  }
   0x6 LB: > { %s953_s25 = sadd.s32 4294967295, %s886_s24   ;;  %s607_s26 = sadd.s32 4294967294, %s886_s24   ;;  %s886_s24 = sphi %s938_s24, %s1210_s24   ;;  %s882_s23 = sphi %s936_s23, %s1209_s23   ;;  %s878_s22 = sphi %s934_s22, %s1208_s22   ;;  %s874_s21 = sphi %s932_s21, %s1207_s21  }
   0x7   : > { %p43_p0 = scmp.ne.s32.totalorder %s878_s22, %s874_s21  ;;  %p1191_p1 = scmp.eq.s32.totalorder %s953_s25, 0 }
   0x8   : > { %p178_p3 = scmp.eq.s32.totalorder %s607_s26, 1  ;;  %p608_p5 = scmp.ge.s32.totalorder %s886_s24, 1 }
   0x9   : > { %p962_p4 = por %p1191_p1, %p43_p0  ;;  %p185_p7 = scmp.lt.s32.totalorder %s886_s24, 3 }
   0xa   : > { %p967_p6 = por %p178_p3, %p43_p0  ;;  %s888_s30 = smov [#allocation6]  }
   0xb   : > { %s1194_s27 = scalar_select %p962_p4, 1, 0 }
   0xc   : > { %s1195_s28 = scalar_select %p967_p6, 1, 0 }
   0xd   : > { %p972_p8 = pnand %p608_p5, %p185_p7  ;;  %s197_s7 = sshll.u32 %s888_s30, 4  ;;  %s976_s7 = int_to_ptr.vmem [resolvable:$true] %s197_s7 }
   0xe   : > { %s889_s9 = smov [#allocation8]   ;;  %s730_s13 = scalar_lea.hbm %s1185_s1, 640 }
   0xf   : > { %p664_p9 = pneg %p972_p8  ;;  %s210_s10 = sshll.u32 %s889_s9, 4  ;;  %s987_s10 = int_to_ptr.vmem [resolvable:$true] %s210_s10 }
  0x10   : > { %p731_p12 = scmp.ne.s32.totalorder %s1185_s1, %s730_s13  ;;  %p737_p5 = scmp.lt.u32.totalorder %s730_s13, %s1185_s1 }
  0x11   : > { %p983_p11 = pnand %p664_p9, %p1191_p1 }
  0x13   : > { %p732_p13 = pneg %p983_p11 }
  0x15   : > { %p733_p0 = pnand %p732_p13, %p731_p12 }
  0x17   : > { %p734_p3 = pneg %p733_p0 }
  0x19   : > { %p739_p7 = pnand %p737_p5, %p734_p3 }
  0x1b   : > { %742 = shalt.err (!%p739_p7)
}
  0x1c   : > { %s743_s18 = scalar_lea.vmem %s976_s7, 640  ;;  %p751_p2 = scmp.lt.s32.totalorder %s976_s7, %s976_s7 }
  0x1d   : > { %p744_p9 = scmp.ne.s32.totalorder %s976_s7, %s743_s18  ;;  %p752_p12 = scmp.lt.s32.totalorder %s743_s18, %s743_s18 }
  0x1f   : > { %p746_p10 = pnand %p744_p9, %p732_p13  ;;  %p753_p0 = por %p752_p12, %p751_p2 }
  0x21   : > { %p747_p1 = pneg %p746_p10 }
  0x23   : > { %p754_p6 = pnand %p753_p0, %p747_p1 }
  0x25   : > { %757 = shalt.err (!%p754_p6)
}
  0x26   : > { %s890_s19 = smov 128   ;;  %s891_s20 = smov 8  }
  0x27   : > { %667 = dma.hbm_to_vmem [thread:$0]  (!%p983_p11), %s1185_s1, 640, %s976_s7, [#allocation7], %s890_s19, %s890_s19, %s891_s20  }
  0x28   : > { %s758_s12 = scalar_lea.hbm %s1186_s2, 256 }
  0x29   : > { %p759_p2 = scmp.ne.s32.totalorder %s1186_s2, %s758_s12  ;;  %p765_p10 = scmp.lt.u32.totalorder %s758_s12, %s1186_s2 }
  0x2b   : > { %p761_p1 = pnand %p759_p2, %p732_p13 }
  0x2d   : > { %p762_p6 = pneg %p761_p1 }
  0x2f   : > { %p767_p3 = pnand %p765_p10, %p762_p6 }
  0x31   : > { %770 = shalt.err (!%p767_p3)
}
  0x32   : > { %s771_s7 = scalar_lea.vmem %s987_s10, 256  ;;  %p779_p12 = scmp.lt.s32.totalorder %s987_s10, %s987_s10 }
  0x33   : > { %p772_p5 = scmp.ne.s32.totalorder %s987_s10, %s771_s7  ;;  %p780_p0 = scmp.lt.s32.totalorder %s771_s7, %s771_s7 }
  0x35   : > { %p774_p7 = pnand %p772_p5, %p732_p13  ;;  %p781_p2 = por %p780_p0, %p779_p12 }
  0x37   : > { %p775_p9 = pneg %p774_p7 }
  0x39   : > { %p782_p1 = pnand %p781_p2, %p775_p9 }
  0x3b   : > { %785 = shalt.err (!%p782_p1)
}
  0x3c   : > { %670 = dma.hbm_to_vmem [thread:$0]  (!%p983_p11), %s1186_s2, 256, %s987_s10, [#allocation7], %s890_s19, %s890_s19, %s891_s20  }
  0x3d   : > { %s1042_s26 = sadd.s32 1, %s886_s24   ;;  %s30_s8 = sadd.s32 1, %s882_s23 }
  0x3e   : > { %s27_s30 = ssub.s32 %s886_s24, %s1042_s26  ;;  %p37_p13 = scmp.ne.s32.totalorder %s882_s23, %s878_s22 }
  0x3f   : > { %p28_p6 = scmp.eq.s32.totalorder %s27_s30, 0  ;;  %p38_p10 = scmp.eq.s32.totalorder %s886_s24, 0 }
  0x40   : > { %p1198_p3 = scmp.eq.s32.totalorder %s953_s25, 1  ;;  %p681_p7 = scmp.lt.s32.totalorder %s886_s24, 2 }
  0x41   : > { %s1058_s11 = scalar_select %p28_p6, %s882_s23, %s30_s8  }
  0x42   : > { %p1052_p5 = por %p1198_p3, %p37_p13  ;;  %p39_p9 = por %p38_p10, %p37_p13 }
  0x43   : > { %s233_s12 = sand.u32 1, %s882_s23   ;;  %s613_s10 = sshll.u32 %s886_s24, 7 }
  0x44   : > { %s1199_s9 = scalar_select %p1052_p5, 1, 0 }
  0x45   : > { %s612_s13 = sshll.u32 %s233_s12, 3  ;;  %s1065_s14 = scalar_lea.hbm %s1184_s0, %s613_s10 }
  0x46   : > { %s237_s15 = scalar_lea.vmem [#allocation3], %s612_s13  ;;  %p1069_p11 = pnand %p681_p7, %p39_p9 }
  0x47   : > { %s244_s16 = sshll.u32 %s237_s15, 4  ;;  %s234_s17 = scalar_lea.sflag [#allocation4], %s233_s12  ;;  %s1067_s16 = int_to_ptr.vmem [resolvable:$true] %s244_s16 }
  0x48   : > { %s786_s18 = scalar_lea.hbm %s1065_s14, 128  ;;  %p788_p0 = pneg %p1069_p11 }
  0x49   : > { %p787_p12 = scmp.ne.s32.totalorder %s1065_s14, %s786_s18  ;;  %s791_s13 = scalar_lea.hbm %s1184_s0, 256 }
  0x4a   : > { %p792_p13 = scmp.lt.u32.totalorder %s1065_s14, %s1184_s0  ;;  %p793_p6 = scmp.lt.u32.totalorder %s791_s13, %s786_s18 }
  0x4b   : > { %p789_p2 = pnand %p788_p0, %p787_p12  ;;  %p795_p3 = scmp.lt.u32.totalorder %s786_s18, %s1065_s14 }
  0x4c   : > { %p794_p10 = por %p793_p6, %p792_p13 }
  0x4d   : > { %p790_p1 = pneg %p789_p2 }
  0x4e   : > { %p796_p7 = por %p795_p3, %p794_p10 }
  0x50   : > { %p797_p9 = pnand %p796_p7, %p790_p1 }
  0x52   : > { %800 = shalt.err (!%p797_p9)
}
  0x53   : > { %s801_s12 = scalar_lea.vmem %s1067_s16, 128  ;;  %s892_s20 = smov [#allocation3]  }
  0x54   : > { %p802_p12 = scmp.ne.s32.totalorder %s1067_s16, %s801_s12  ;;  %s806_s15 = sshll.u32 %s892_s20, 4  ;;  %s807_s15 = int_to_ptr.vmem [resolvable:$false] %s806_s15 }
  0x55   : > { %s808_s8 = scalar_lea.vmem %s807_s15, 256  ;;  %p809_p4 = scmp.lt.s32.totalorder %s1067_s16, %s807_s15 }
  0x56   : > { %p804_p2 = pnand %p802_p12, %p788_p0  ;;  %p810_p13 = scmp.lt.s32.totalorder %s808_s8, %s801_s12 }
  0x58   : > { %p805_p5 = pneg %p804_p2  ;;  %p811_p6 = por %p810_p13, %p809_p4 }
  0x5a   : > { %p812_p10 = pnand %p811_p6, %p805_p5 }
  0x5c   : > { %815 = shalt.err (!%p812_p10)
}
  0x5d   : > { %674 = dma.hbm_to_vmem [thread:$0]  (!%p1069_p11), %s1065_s14, 128, %s1067_s16, %s234_s17  }
  0x5e   : > { %253 = sbr.rel (%p972_p8) target bundleno = 718 (0x2ce), region = 44  ;;  %s1101_s18 = sand.u32 (!%p972_p8), 1, %s878_s22  }
  0x5f   : > { %s615_s30 = sshll.u32 (!%p972_p8), %s1101_s18, 3  ;;  %s256_s13 = scalar_lea.sflag (!%p972_p8), [#allocation4], %s1101_s18 }
  0x60   : > { %s259_s10 = scalar_lea.vmem (!%p972_p8), [#allocation3], %s615_s30  ;;  %p1201_p4 = scmp.ne.s32.totalorder (!%p972_p8), %s1194_s27, 0 }
  0x65   : > { %861 = dma.done.wait (%p1201_p4), %s256_s13, 128  }
  0x66   : > { %863 = vsyncadd (%p1201_p4), %s256_s13, 4294967168  ;;  %p1202_p5 = scmp.eq.s32.totalorder %s953_s25, 0 }
  0x68   : > { %865 = dma.done.wait (%p1202_p5), [#allocation7], 896   ;;  %p1203_p8 = pmov %p1202_p5 }
  0x69   : > { %vm376_vm0 = vcmask 785408   ;;  %v893_v0 = vmov 0.0|0.0   ;;  %v894_v1 = vmov 0.0   ;;  %vm895_vm1 = vmmov 0   ;;  %v297_v2 = vld [vmem:[#allocation6] sm:$0xff]  ;;  %v298_v3 = vld [vmem:[#allocation6 + $0x8] sm:$0xff] }
  0x6a   : > { %867 = vsyncadd (%p1203_p8), [#allocation7], 4294966400  ;;  %646 = vmatprep.subr.bf16.mxu0 %v893_v0  ;;  %377 = vst.msk [vmem:[#allocation2] sm:$0xff] %vm376_vm0, %v894_v1  ;;  %643 = vmatprep.mubr.msk.f32.mxu0 %vm895_vm1, %v894_v1  ;;  %v299_v4 = vld [vmem:[#allocation6 + $0x10] sm:$0xff]  ;;  %v647_v5 = vpack.c.bf16 %v298_v3, %v297_v2  ;;  %v300_v6 = vld [vmem:[#allocation6 + $0x18] sm:$0xff]  ;;  %vm302_vm2 = vcmask 326656   ;;  %v384_v10 = vlaneseq }
  0x6b   : > { %378 = vst.msk [vmem:[#allocation2 + $0x10] sm:$0xff] %vm376_vm0, %v894_v1  ;;  %v650_v7 = vpack.c.bf16 %v300_v6, %v299_v4  ;;  %v301_v8 = vld [vmem:[#allocation6 + $0x20] sm:$0xff]  ;;  %v296_v9 = vld [vmem:[%s259_s10] sm:$0xff]  ;;  %v380_v15 = vld [vmem:[#allocation8] sm:$0xff]  ;;  %s624_s19 = sshll.u32 %s953_s25, 7  ;;  %s295_s12 = scalar_lea.vmem [#allocation9], %s615_s30 }
  0x6c   : > { %648 = vmatpush3.bf16.msra.mxu0 %v647_v5  ;;  %v385_v11 = vshrl.u32 %v384_v10, 7  ;;  %v620_v21 = vld [vmem:[%s1187_s3] ss:$0 sm:$0xff]  ;;  %v381_v46 = vld [vmem:[#allocation8 + $0x8] sm:$0x7]  ;;  %s518_s20 = sshll.u32 %s295_s12, 4  ;;  %s1139_s13 = scalar_lea.hbm %s1190_s6, %s624_s19  ;;  %s1141_s20 = int_to_ptr.vmem [resolvable:$true] %s518_s20 }
  0x6d   : > { %649 = vmatprep.subr.bf16.mxu0 %v893_v0  ;;  %s505_s10 = scalar_lea.sflag [#allocation5], %s1101_s18  ;;  %s816_s27 = scalar_lea.vmem %s1141_s20, 128 }
  0x6e   : > { %v386_v14 = vsub.s32 0, %v385_v11  ;;  %v399_v16 = vsub.s32 1, %v385_v11  ;;  %v406_v18 = vsub.s32 2, %v385_v11  ;;  %v413_v20 = vsub.s32 3, %v385_v11  ;;  %p817_p11 = scmp.ne.s32.totalorder %s1141_s20, %s816_s27  ;;  %p1204_p0 = scmp.ne.s32.totalorder %s1199_s9, 0 }
  0x6f   : > { %v420_v26 = vsub.s32 4, %v385_v11  ;;  %v427_v31 = vsub.s32 5, %v385_v11  ;;  %v434_v36 = vsub.s32 6, %v385_v11  ;;  %v441_v41 = vsub.s32 7, %v385_v11  ;;  %s896_s25 = smov [#allocation9]  }
  0x70   : > { %651 = vmatpush3.bf16.msra.mxu0 %v650_v7  ;;  %v387_v17 = vrot.slane %v380_v15, %v386_v14  ;;  %v400_v19 = vrot.slane %v380_v15, %v399_v16  ;;  %v407_v25 = vrot.slane %v380_v15, %v406_v18  ;;  %v414_v30 = vrot.slane %v380_v15, %v413_v20  ;;  %p818_p1 = pnand %p817_p11, %p1204_p0  ;;  %s820_s30 = sshll.u32 %s896_s25, 4  ;;  %s821_s30 = int_to_ptr.vmem [resolvable:$false] %s820_s30 }
  0x71   : > { %641 = vmatprep.subr.mxu0 %v894_v1  ;;  %v421_v35 = vrot.slane %v380_v15, %v420_v26  ;;  %v428_v40 = vrot.slane %v380_v15, %v427_v31  ;;  %v435_v45 = vrot.slane %v380_v15, %v434_v36  ;;  %v442_v50 = vrot.slane %v380_v15, %v441_v41  ;;  %s822_s29 = scalar_lea.vmem %s821_s30, 256  ;;  %p823_p7 = scmp.lt.s32.totalorder %s1141_s20, %s821_s30 }
  0x72   : > { %v449_v54 = vrot.slane %v381_v46, %v386_v14  ;;  %v456_v58 = vrot.slane %v381_v46, %v399_v16  ;;  %v463_v62 = vrot.slane %v381_v46, %v406_v18  ;;  %p819_p3 = pneg %p818_p1  ;;  %p824_p9 = scmp.lt.s32.totalorder %s822_s29, %s816_s27 }
  0x74   : > { %642 = vmatpush3.msra.mxu0 %v301_v8  ;;  %p825_p12 = por %p824_p9, %p823_p7 }
  0x75   : > { %644 = vmatmul.mubr.msk.f32.vlgmr.msra.gmra.mrb[0].mxu0 %vm302_vm2, %v296_v9 }
  0x76   : > { %p826_p2 = pnand %p825_p12, %p819_p3 }
 0x148   : > { %v1117_v12 = vpop.f32.mrb[0].mxu0 }
 0x149   : > { %379 = vst.msk [vmem:[#allocation2 + $0x8] sm:$0xff] %vm376_vm0, %v1117_v12  ;;  %v645_v13 = vpop.f32.mrb[1].mxu0 }
 0x150   : > { %v383_v22 = vld [vmem:[#allocation2 + $0x3] sm:$0xff]  ;;  %v445_v55 = vld [vmem:[#allocation2 + $0xb] sm:$0xff] }
 0x151   : > { %v396_v23 = vld [vmem:[#allocation2 + $0x4] sm:$0xff]  ;;  %v388_v24 = vmul.f32 %v387_v17, %v383_v22  ;;  %v452_v59 = vld [vmem:[#allocation2 + $0xc] sm:$0xff]  ;;  %v450_v61 = vmul.f32 %v449_v54, %v445_v55 }
 0x152   : > { %v403_v27 = vld [vmem:[#allocation2 + $0x5] sm:$0xff]  ;;  %v401_v29 = vmul.f32 %v400_v19, %v396_v23  ;;  %v459_v63 = vld [vmem:[#allocation2 + $0xd] sm:$0xff]  ;;  %v457_v1 = vmul.f32 %v456_v58, %v452_v59  ;;  %v622_v23 = vld [vmem:[%s1189_s5] ss:$0 sm:$0xff] }
 0x153   : > { %v395_v28 = vadd.f32 %v620_v21, %v388_v24  ;;  %v410_v32 = vld [vmem:[#allocation2 + $0x6] sm:$0xff]  ;;  %v408_v34 = vmul.f32 %v407_v25, %v403_v27  ;;  %v464_v3 = vmul.f32 %v463_v62, %v459_v63 }
 0x154   : > { %v417_v37 = vld [vmem:[#allocation2 + $0x7] sm:$0xff]  ;;  %v415_v39 = vmul.f32 %v414_v30, %v410_v32 }
 0x155   : > { %v402_v33 = vadd.f32 %v401_v29, %v395_v28  ;;  %v424_v42 = vld [vmem:[#allocation2 + $0x8] sm:$0xff]  ;;  %v422_v44 = vmul.f32 %v421_v35, %v417_v37 }
 0x156   : > { %v431_v47 = vld [vmem:[#allocation2 + $0x9] sm:$0xff]  ;;  %v429_v49 = vmul.f32 %v428_v40, %v424_v42 }
 0x157   : > { %v409_v38 = vadd.f32 %v408_v34, %v402_v33  ;;  %v438_v51 = vld [vmem:[#allocation2 + $0xa] sm:$0xff]  ;;  %v436_v53 = vmul.f32 %v435_v45, %v431_v47 }
 0x158   : > { %v443_v57 = vmul.f32 %v442_v50, %v438_v51 }
 0x159   : > { %v416_v43 = vadd.f32 %v415_v39, %v409_v38 }
 0x15b   : > { %v423_v48 = vadd.f32 %v422_v44, %v416_v43 }
 0x15d   : > { %v430_v52 = vadd.f32 %v429_v49, %v423_v48 }
 0x15f   : > { %v437_v56 = vadd.f32 %v436_v53, %v430_v52 }
 0x161   : > { %v444_v60 = vadd.f32 %v443_v57, %v437_v56 }
 0x163   : > { %v451_v0 = vadd.f32 %v450_v61, %v444_v60 }
 0x165   : > { %v458_v2 = vadd.f32 %v457_v1, %v451_v0 }
 0x167   : > { %v465_v4 = vadd.f32 %v464_v3, %v458_v2 }
 0x169   : > { %v466_v5 = vsub.f32 0.0, %v465_v4 }
 0x16b   : > { %v467_v6 = vmul.f32 1.442695, %v466_v5 }
 0x16d   : > { %724 = vpow2.f32 %v467_v6 }
 0x177   : > { %v725_v7 = vpop.eup %724 }
 0x178   : > { %v469_v8 = vadd.f32 1.0, %v725_v7 }
 0x17a   : > { %726 = vrcp.f32 %v469_v8 }
 0x184   : > { %v727_v9 = vpop.eup %726 }
 0x185   : > { %v472_v10 = vmul.f32 %v727_v9, %v1117_v12  ;;  %v621_v12 = vld [vmem:[%s1188_s4] ss:$0 sm:$0xff] }
 0x187   : > { %v473_v11 = vsel %vm376_vm0, %v472_v10, 0.0 }
 0x188   : > { %474 = vadd.xlane.f32.xlu0 %v473_v11 }
 0x215   : > { %v475_v13 = vpop.xlane.xlu0 %474 }
 0x216   : > { %v477_v14 = vmul.f32 0.010416667, %v475_v13 }
 0x218   : > { %v478_v15 = vsub.f32 %v472_v10, %v477_v14 }
 0x21a   : > { %v479_v16 = vmul.f32 %v478_v15, %v478_v15 }
 0x21c   : > { %v480_v17 = vsel %vm376_vm0, %v479_v16, 0.0 }
 0x21d   : > { %481 = vadd.xlane.f32.xlu0 %v480_v17 }
 0x2aa   : > { %v482_v18 = vpop.xlane.xlu0 %481 }
 0x2ab   : > { %v483_v19 = vmul.f32 0.010416667, %v482_v18 }
 0x2ad   : > { %v484_v20 = vadd.f32 1e-06, %v483_v19 }
 0x2af   : > { %728 = vrsqrt.f32 %v484_v20 }
 0x2b9   : > { %v729_v21 = vpop.eup %728 }
 0x2ba   : > { %v493_v22 = vmul.f32 %v729_v21, %v621_v12 }
 0x2bc   : > { %v494_v24 = vmul.f32 %v493_v22, %v478_v15 }
 0x2be   : > { %v502_v25 = vadd.f32 %v622_v23, %v494_v24 }
 0x2c0   : > { %503 = vst.msk [vmem:[%s295_s12] sm:$0xff] %vm376_vm0, %v502_v25 }
 0x2c1   : > { %829 = shalt.err (!%p826_p2)
}
 0x2c2   : > { %s830_s18 = scalar_lea.hbm %s1139_s13, 128  ;;  %s834_s7 = scalar_lea.hbm %s1190_s6, 256 }
 0x2c3   : > { %p831_p13 = scmp.ne.s32.totalorder %s1139_s13, %s830_s18  ;;  %p835_p4 = scmp.lt.u32.totalorder %s1139_s13, %s1190_s6 }
 0x2c4   : > { %p836_p5 = scmp.lt.u32.totalorder %s834_s7, %s830_s18  ;;  %p838_p11 = scmp.lt.u32.totalorder %s830_s18, %s1139_s13 }
 0x2c5   : > { %p832_p6 = pnand %p831_p13, %p1204_p0 }
 0x2c6   : > { %p837_p8 = por %p836_p5, %p835_p4 }
 0x2c7   : > { %p833_p10 = pneg %p832_p6 }
 0x2c8   : > { %p839_p1 = por %p838_p11, %p837_p8 }
 0x2ca   : > { %p840_p3 = pnand %p839_p1, %p833_p10 }
 0x2cc   : > { %843 = shalt.err (!%p840_p3)
}
 0x2cd   : > { %662 = dma.vmem_to_hbm [thread:$0]  (%p1204_p0), %s1141_s20, 128, %s1139_s13, %s505_s10  }
 0x2ce PF: > { %s530_s12 = sand.u32 1, %s874_s21   ;;  %p1205_p7 = scmp.ne.s32.totalorder %s1195_s28, 0 }
 0x2cf   : > { %p1206_p9 = scmp.ge.s32.totalorder %s886_s24, 2  ;;  %s531_s15 = scalar_lea.sflag [#allocation5], %s530_s12 }
 0x2d1   : > { %p676_p12 = pnand %p1206_p9, %p1205_p7 }
 0x2d3   : > { %869 = dma.done.wait (!%p676_p12), %s531_s15, 128  }
 0x2d4   : > { %871 = vsyncadd (!%p676_p12), %s531_s15, 4294967168  ;;  %p20_p2 = scmp.ge.s32.totalorder %s1042_s26, 4   ;;  %s1207_s21 = smov %s878_s22 }
 0x2d5   : > { %s1208_s22 = smov %s882_s23  ;;  %s1209_s23 = smov %s1058_s11 }
 0x2d6   : > { %s1210_s24 = smov %s1042_s26  ;;  %22 = sbr.rel (!%p20_p2) target bundleno = 6 (0x6), region = 97 }
 0x2dd   :  { %536 = vsyncpa [#allocation4], 1 }
 0x2de   :  { %538 = vsyncpa [#allocation4 + $0x1], 1 }
 0x2df   :  { %539 = vsyncpa [#allocation7], 1 }
 0x2e0   :  { %540 = vsyncpa [#allocation5], 1 }
 0x2e1   :  { %542 = vsyncpa [#allocation5 + $0x1], 1 }

</bundles_post_ra>
